<compile_context>
chip_gen: v7x
topology: tpu7x:2x2x1
jax: 0.10.0
libtpu: 0.0.40
codegen_flags: <defaults>
</compile_context>

<pallas_src>
import functools

import jax
import jax.numpy as jnp
from jax.experimental import pallas as pl
from jax.experimental.pallas import tpu as pltpu


def _round_up(x, m):
    return ((x + m - 1) // m) * m


def _matmul_bias_silu_kernel(x_ref, w_ref, b_ref, o_ref, acc_ref):
    """Fused (TM, TK) @ (TK, TN) matmul + bias + SiLU with f32 VMEM accumulator."""
    @pl.when(pl.program_id(2) == 0)
    def _init():
        acc_ref[...] = jnp.zeros_like(acc_ref)

    acc_ref[...] += jnp.dot(
        x_ref[...], w_ref[...], preferred_element_type=jnp.float32
    )

    @pl.when(pl.program_id(2) == pl.num_programs(2) - 1)
    def _finalize():
        y = acc_ref[...] + b_ref[...]          # bias (f32)
        # TODO(synk): BatchNorm2d path (norm=True) not implemented; default ConvLayer uses Identity.
        o_ref[...] = (y * jax.nn.sigmoid(y)).astype(o_ref.dtype)   # SiLU


def conv_layer_forward(x_nchw, weight_oihw, bias, *, stride, pad,
                       compute_dtype=jnp.float32):
    """Pallas implementation of ConvLayer.forward (Conv2d(bias=True) + SiLU).

    compute_dtype: dtype of the matmul operands (jnp.bfloat16 recommended on
    v6e/v7x; accumulation is always f32).
    """
    N, Cin, H, W = x_nchw.shape
    Cout, _, KH, KW = weight_oihw.shape
    OH = (H + 2 * pad - KH) // stride + 1
    OW = (W + 2 * pad - KW) // stride + 1

    # ---------- layout plumbing in plain JAX: NCHW -> NHWC, pad, im2col ----------
    x_nhwc = jnp.transpose(x_nchw, (0, 2, 3, 1))
    x_p = jnp.pad(x_nhwc, ((0, 0), (pad, pad), (pad, pad), (0, 0)))

    patches = []
    for kh in range(KH):
        for kw in range(KW):
            patches.append(
                jax.lax.slice(
                    x_p,
                    (0, kh, kw, 0),
                    (N, kh + (OH - 1) * stride + 1, kw + (OW - 1) * stride + 1, Cin),
                    (1, stride, stride, 1),
                )
            )
    # K index order = ((kh*KW)+kw)*Cin + cin, matched by the weight reshape below.
    x_col = jnp.concatenate(patches, axis=-1).reshape(N * OH * OW, KH * KW * Cin)
    w_col = jnp.transpose(weight_oihw, (2, 3, 1, 0)).reshape(KH * KW * Cin, Cout)

    M, Kc = x_col.shape

    # ---------- pad to lane/sublane-friendly sizes (zeros are exact) ----------
    Np = _round_up(Cout, 128)              # lane-dense output / weight columns
    Kp = _round_up(Kc, 128)                # lane-dense contraction dim
    TM = min(256, _round_up(M, 8))         # M tile (>=2 tiles at M=512 -> megacore)
    Mp = _round_up(M, TM)
    TN = min(256, Np)                      # Cout tile
    TK = min(512, Kp)                      # K (reduction) tile

    x_col = jnp.pad(x_col, ((0, Mp - M), (0, Kp - Kc))).astype(compute_dtype)
    w_col = jnp.pad(w_col, ((0, Kp - Kc), (0, Np - Cout))).astype(compute_dtype)
    b_p = jnp.pad(bias.astype(jnp.float32), (0, Np - Cout)).reshape(1, Np)

    grid = (Mp // TM, Np // TN, Kp // TK)

    itemsize = jnp.dtype(compute_dtype).itemsize
    out_itemsize = jnp.dtype(x_nchw.dtype).itemsize
    cost = pl.CostEstimate(
        flops=2 * Mp * Kp * Np,
        transcendentals=Mp * Np,                       # sigmoid
        bytes_accessed=(Mp * Kp + Kp * Np) * itemsize + Mp * Np * out_itemsize,
    )

    out = pl.pallas_call(
        _matmul_bias_silu_kernel,
        out_shape=jax.ShapeDtypeStruct((Mp, Np), x_nchw.dtype),
        grid_spec=pltpu.PrefetchScalarGridSpec(
            num_scalar_prefetch=0,
            grid=grid,
            in_specs=[
                pl.BlockSpec((TM, TK), lambda i, j, k: (i, k)),
                pl.BlockSpec((TK, TN), lambda i, j, k: (k, j)),
                pl.BlockSpec((1, TN), lambda i, j, k: (0, j)),
            ],
            out_specs=pl.BlockSpec((TM, TN), lambda i, j, k: (i, j)),
            scratch_shapes=[pltpu.VMEM((TM, TN), jnp.float32)],
        ),
        compiler_params=pltpu.CompilerParams(
            dimension_semantics=("parallel", "parallel", "arbitrary"),
            # v7x-first budget: tiles above give ~<2 MiB of double-buffered VMEM,
            # well under the 32 MiB scoped limit we request explicitly.
            vmem_limit_bytes=32 * 1024 * 1024,
        ),
        cost_estimate=cost,
    )(x_col, w_col, b_p)

    # ---------- strip padding, back to NCHW ----------
    out = out[:M, :Cout].reshape(N, OH, OW, Cout)
    return jnp.transpose(out, (0, 3, 1, 2))


def _reference_forward(x_nchw, weight_oihw, bias, *, stride, pad):
    y = jax.lax.conv_general_dilated(
        x_nchw, weight_oihw,
        window_strides=(stride, stride),
        padding=[(pad, pad), (pad, pad)],
        dimension_numbers=("NCHW", "OIHW", "NCHW"),
    )
    y = y + bias.reshape(1, -1, 1, 1)
    return y * jax.nn.sigmoid(y)


if __name__ == "__main__":
    # ConvLayer(in_ch=4, out_ch=8, ksize=3, pad=1, stride=1, bias=True, norm=False)
    N, Cin, H, W = 2, 4, 16, 16
    Cout, K, pad, stride = 8, 3, 1, 1

    key = jax.random.PRNGKey(0)
    kx, kw, kb = jax.random.split(key, 3)
    x = jax.random.normal(kx, (N, Cin, H, W), dtype=jnp.float32)
    weight = jax.random.normal(kw, (Cout, Cin, K, K), dtype=jnp.float32) * 0.1
    bias = jax.random.normal(kb, (Cout,), dtype=jnp.float32) * 0.1

    # f32 path: exact match vs. XLA conv reference.
    out = conv_layer_forward(x, weight, bias, stride=stride, pad=pad)
    out = jax.block_until_ready(out)
    ref = _reference_forward(x, weight, bias, stride=stride, pad=pad)
    assert out.shape == ref.shape, (out.shape, ref.shape)
    assert jnp.allclose(out, ref, atol=1e-4, rtol=1e-4), float(jnp.max(jnp.abs(out - ref)))

    # stride=2 path (decimation handled in the wrapper, kernel unchanged).
    out_s2 = conv_layer_forward(x, weight, bias, stride=2, pad=pad)
    out_s2 = jax.block_until_ready(out_s2)
    ref_s2 = _reference_forward(x, weight, bias, stride=2, pad=pad)
    assert out_s2.shape == ref_s2.shape, (out_s2.shape, ref_s2.shape)
    assert jnp.allclose(out_s2, ref_s2, atol=1e-4, rtol=1e-4), float(
        jnp.max(jnp.abs(out_s2 - ref_s2)))

    # bf16-input / f32-accumulate path (recommended on v6e/v7x); looser tolerance.
    out_bf16 = conv_layer_forward(x, weight, bias, stride=stride, pad=pad,
                                  compute_dtype=jnp.bfloat16)
    out_bf16 = jax.block_until_ready(out_bf16)
    assert jnp.allclose(out_bf16, ref, atol=5e-2, rtol=5e-2), float(
        jnp.max(jnp.abs(out_bf16 - ref)))

    print("KERNEL_OK")
</pallas_src>

<mosaic_0001>
module attributes {stable_mosaic.version = 11 : i64} {
  func.func @_matmul_bias_silu_kernel(%arg0: i32, %arg1: i32, %arg2: i32, %arg3: memref<256x128xf32, #tpu.memory_space<vmem>>, %arg4: memref<128x128xf32, #tpu.memory_space<vmem>>, %arg5: memref<1x128xf32, #tpu.memory_space<vmem>>, %arg6: memref<256x128xf32, #tpu.memory_space<vmem>>, %arg7: memref<256x128xf32, #tpu.memory_space<vmem>>) attributes {dimension_semantics = [#tpu.dimension_semantics<parallel>, #tpu.dimension_semantics<parallel>, #tpu.dimension_semantics<arbitrary>], iteration_bounds = array<i64: 2, 1, 1>, scalar_prefetch = 0 : i64, scratch_operands = 1 : i64, tpu.core_type = #tpu.core_type<tc>, window_params = [{transform_indices = @transform_0, window_bounds = array<i64: 256, 128>}, {transform_indices = @transform_1, window_bounds = array<i64: 128, 128>}, {transform_indices = @transform_2, window_bounds = array<i64: 1, 128>}, {transform_indices = @transform_3, window_bounds = array<i64: 256, 128>}]} {
    %c0_i32 = arith.constant 0 : i32
    %0 = arith.cmpi eq, %arg2, %c0_i32 : i32
    %1 = arith.extui %0 : i1 to i32
    %c0_i32_0 = arith.constant 0 : i32
    %2 = arith.cmpi ne, %1, %c0_i32_0 : i32
    scf.if %2 {
      %cst_10 = arith.constant 0.000000e+00 : f32
      %12 = vector.broadcast %cst_10 : f32 to vector<256x128xf32>
      %c0_11 = arith.constant 0 : index
      %c0_12 = arith.constant 0 : index
      %13 = vector.load %arg7[%c0_11, %c0_12] : memref<256x128xf32, #tpu.memory_space<vmem>>, vector<256x128xf32>
      tpu.vector_store %arg7[%c0_11, %c0_12], %12 {strides = array<i32>} : memref<256x128xf32, #tpu.memory_space<vmem>>, vector<256x128xf32>,
    } else {
    }
    %c0 = arith.constant 0 : index
    %c0_1 = arith.constant 0 : index
    %3 = vector.load %arg7[%c0, %c0_1] : memref<256x128xf32, #tpu.memory_space<vmem>>, vector<256x128xf32>
    %c0_2 = arith.constant 0 : index
    %c0_3 = arith.constant 0 : index
    %4 = vector.load %arg3[%c0_2, %c0_3] : memref<256x128xf32, #tpu.memory_space<vmem>>, vector<256x128xf32>
    %c0_4 = arith.constant 0 : index
    %c0_5 = arith.constant 0 : index
    %5 = vector.load %arg4[%c0_4, %c0_5] : memref<128x128xf32, #tpu.memory_space<vmem>>, vector<128x128xf32>
    %cst = arith.constant dense<0.000000e+00> : vector<256x128xf32>
    %6 = tpu.matmul %4, %5, %cst {dimension_numbers = #tpu.dot_dimension_numbers<[1], [0], [0], [1], [0, 0, 1, 1], [], []>} : vector<256x128xf32>, vector<128x128xf32>, vector<256x128xf32> -> vector<256x128xf32>
    %7 = arith.addf %3, %6 : vector<256x128xf32>
    %c0_6 = arith.constant 0 : index
    %c0_7 = arith.constant 0 : index
    %8 = vector.load %arg7[%c0_6, %c0_7] : memref<256x128xf32, #tpu.memory_space<vmem>>, vector<256x128xf32>
    tpu.vector_store %arg7[%c0_6, %c0_7], %7 {strides = array<i32>} : memref<256x128xf32, #tpu.memory_space<vmem>>, vector<256x128xf32>,
    %c0_i32_8 = arith.constant 0 : i32
    %9 = arith.cmpi eq, %arg2, %c0_i32_8 : i32
    %10 = arith.extui %9 : i1 to i32
    %c0_i32_9 = arith.constant 0 : i32
    %11 = arith.cmpi ne, %10, %c0_i32_9 : i32
    scf.if %11 {
      %c0_10 = arith.constant 0 : index
      %c0_11 = arith.constant 0 : index
      %12 = vector.load %arg7[%c0_10, %c0_11] : memref<256x128xf32, #tpu.memory_space<vmem>>, vector<256x128xf32>
      %c0_12 = arith.constant 0 : index
      %c0_13 = arith.constant 0 : index
      %13 = vector.load %arg5[%c0_12, %c0_13] : memref<1x128xf32, #tpu.memory_space<vmem>>, vector<1x128xf32>
      %14 = vector.broadcast %13 : vector<1x128xf32> to vector<256x128xf32>
      %15 = arith.addf %12, %14 : vector<256x128xf32>
      %16 = arith.negf %15 : vector<256x128xf32>
      %17 = math.exp %16 : vector<256x128xf32>
      %cst_14 = arith.constant 1.000000e+00 : f32
      %18 = vector.broadcast %cst_14 : f32 to vector<256x128xf32>
      %19 = arith.addf %18, %17 : vector<256x128xf32>
      %20 = arith.divf %18, %19 : vector<256x128xf32>
      %21 = arith.mulf %15, %20 : vector<256x128xf32>
      %c0_15 = arith.constant 0 : index
      %c0_16 = arith.constant 0 : index
      %22 = vector.load %arg6[%c0_15, %c0_16] : memref<256x128xf32, #tpu.memory_space<vmem>>, vector<256x128xf32>
      tpu.vector_store %arg6[%c0_15, %c0_16], %21 {strides = array<i32>} : memref<256x128xf32, #tpu.memory_space<vmem>>, vector<256x128xf32>,
    } else {
    }
    return
  }
  func.func @transform_0(%arg0: i32, %arg1: i32, %arg2: i32) -> (i32, i32) {
    %c0_i32 = arith.constant 0 : i32
    return %arg0, %arg2 : i32, i32
  }
  func.func @transform_1(%arg0: i32, %arg1: i32, %arg2: i32) -> (i32, i32) {
    %c0_i32 = arith.constant 0 : i32
    return %arg2, %arg1 : i32, i32
  }
  func.func @transform_2(%arg0: i32, %arg1: i32, %arg2: i32) -> (i32, i32) {
    %c0_i32 = arith.constant 0 : i32
    %c0_i32_0 = arith.constant 0 : i32
    return %c0_i32, %arg1 : i32, i32
  }
  func.func @transform_3(%arg0: i32, %arg1: i32, %arg2: i32) -> (i32, i32) {
    %c0_i32 = arith.constant 0 : i32
    return %arg0, %arg1 : i32, i32
  }
}

</mosaic_0001>

<bundles_post_ra>
// kernel: tpu_custom_call.1
= control target key start
LH: loop header
LB: loop body
LE: loop exit
PB: predicated region body
PF: predicated region fallthrough
CT: control target
= control target key end

     0   :  { %8 = vsyncpa [#allocation4], 0  ;;  %s2211_s0 = inlined_call_operand.hbm [shape: f32[512,128], index: 0, kind: input, shape index: {}]   ;;  %s2212_s1 = inlined_call_operand.hbm [shape: f32[128,128], index: 1, kind: input, shape index: {}]   ;;  %s2213_s2 = inlined_call_operand.vmem [shape: f32[1,128], index: 2, kind: input, shape index: {}]   ;;  %s2214_s3 = inlined_call_operand.hbm [shape: f32[512,128], index: 3, kind: output, shape index: {}]  }
   0x1   :  { %10 = vsyncpa [#allocation4 + $0x1], 0 }
   0x2   :  { %11 = vsyncpa [#allocation7], 0 }
   0x3   :  { %12 = vsyncpa [#allocation5], 0 }
   0x4   :  { %14 = vsyncpa [#allocation5 + $0x1], 0  ;;  %s1727_s12 = smov 0   ;;  %s1729_s13 = smov 0  }
   0x5   :  { %s1731_s14 = smov 0   ;;  %s1733_s15 = smov 0  }
   0x6   :  { %s1735_s16 = smov 0   ;;  %s1737_s17 = smov 0  }
   0x7 LB: > { %s1120_s18 = sadd.s32 4294967295, %s1698_s17   ;;  %s1121_s19 = sadd.s32 4294967294, %s1698_s17   ;;  %s1698_s17 = sphi %s1737_s17, %s20_s17   ;;  %s1694_s16 = sphi %s1735_s16, %s2238_s16   ;;  %s1690_s15 = sphi %s1733_s15, %s2237_s15   ;;  %s1686_s14 = sphi %s1731_s14, %s2236_s14   ;;  %s1682_s13 = sphi %s1729_s13, %s2235_s13   ;;  %s1678_s12 = sphi %s1727_s12, %s2234_s12  }
   0x8   : > { %p61_p0 = scmp.ne.s32.totalorder %s1682_s13, %s1678_s12  ;;  %p1761_p1 = scmp.eq.s32.totalorder %s1120_s18, 0 }
   0x9   : > { %p1765_p2 = scmp.eq.s32.totalorder %s1120_s18, 1  ;;  %p147_p3 = scmp.eq.s32.totalorder %s1121_s19, 1 }
   0xa   : > { %s2219_s20 = scalar_select %p1761_p1, 1, 0 }
   0xb   : > { %s2220_s21 = scalar_select %p1765_p2, 1, 0 }
   0xc   : > { %p1771_p4 = por %p1761_p1, %p61_p0  ;;  %p1122_p5 = scmp.ge.s32.totalorder %s1698_s17, 1 }
   0xd   : > { %p1776_p6 = por %p147_p3, %p61_p0  ;;  %p154_p7 = scmp.lt.s32.totalorder %s1698_s17, 3 }
   0xe   : > { %s2221_s22 = scalar_select %p1771_p4, 1, 0 }
   0xf   : > { %s2222_s23 = scalar_select %p1776_p6, 1, 0 }
  0x10   : > { %p1781_p8 = pnand %p1122_p5, %p154_p7  ;;  %s1700_s25 = smov [#allocation6]  }
  0x11   : > { %s170_s26 = sshll.u32 %s1700_s25, 4  ;;  %s39_s28 = sadd.s32 1, %s1694_s16  ;;  %s171_s26 = int_to_ptr.vmem [resolvable:$true] %s170_s26 }
  0x12   : > { %s2223_s24 = scalar_select %p1781_p8, 1, 0 }
  0x13   : > { %p1357_p9 = pneg %p1781_p8  ;;  %s1554_s4 = scalar_lea.hbm %s2212_s1, 2048 }
  0x14   : > { %p1555_p12 = scmp.ne.s32.totalorder %s2212_s1, %s1554_s4  ;;  %p1561_p5 = scmp.lt.u32.totalorder %s1554_s4, %s2212_s1 }
  0x15   : > { %p1790_p11 = pnand %p1357_p9, %p1761_p1 }
  0x17   : > { %p1556_p13 = pneg %p1790_p11 }
  0x19   : > { %p1557_p0 = pnand %p1556_p13, %p1555_p12 }
  0x1b   : > { %p1558_p3 = pneg %p1557_p0 }
  0x1d   : > { %p1563_p7 = pnand %p1561_p5, %p1558_p3 }
  0x1f   : > { %1566 = shalt.err (!%p1563_p7)
}
  0x20   : > { %s1567_s9 = scalar_lea.vmem %s171_s26, 2048  ;;  %p1575_p1 = scmp.lt.s32.totalorder %s171_s26, %s171_s26 }
  0x21   : > { %p1568_p9 = scmp.ne.s32.totalorder %s171_s26, %s1567_s9  ;;  %p1576_p4 = scmp.lt.s32.totalorder %s1567_s9, %s1567_s9 }
  0x23   : > { %p1570_p10 = pnand %p1568_p9, %p1556_p13  ;;  %p1577_p8 = por %p1576_p4, %p1575_p1 }
  0x25   : > { %p1571_p6 = pneg %p1570_p10 }
  0x27   : > { %p1578_p2 = pnand %p1577_p8, %p1571_p6 }
  0x29   : > { %1581 = shalt.err (!%p1578_p2)
}
  0x2a   : > { %s1701_s10 = smov 128   ;;  %s1702_s11 = smov 8  }
  0x2b   : > { %1360 = dma.hbm_to_vmem [thread:$0]  (!%p1790_p11), %s2212_s1, 2048, %s171_s26, [#allocation7], %s1701_s10, %s1701_s10, %s1702_s11  }
  0x2c   : > { %p41_p1 = scmp.ge.s32.totalorder %s39_s28, 2  ;;  %s48_s25 = sadd.s32 1, %s1686_s14 }
  0x2d   : > { %p55_p2 = scmp.ne.s32.totalorder %s1686_s14, %s1682_s13  ;;  %p56_p4 = scmp.eq.s32.totalorder %s1698_s17, 0 }
  0x2e   : > { %s2240_s28 = smov (%p41_p1, %s39_s28), 0  ;;  %p2226_p8 = scmp.ne.s32.totalorder %s2220_s21, 0 }
  0x2f   : > { %p1820_p6 = por %p56_p4, %p55_p2  ;;  %s43_s30 = ssub.s32 %s1694_s16, %s2240_s28 }
  0x30   : > { %p1826_p10 = por %p2226_p8, %p55_p2  ;;  %p1370_p12 = scmp.lt.s32.totalorder %s1698_s17, 2 }
  0x31   : > { %p46_p11 = scmp.eq.s32.totalorder %s43_s30, 0  ;;  %s190_s26 = sand.u32 1, %s1686_s14  }
  0x32   : > { %s1126_s4 = sshll.u32 %s190_s26, 8  ;;  %s1171_s6 = sshll.u32 %s1694_s16, 12 }
  0x33   : > { %s1835_s5 = scalar_select %p46_p11, %s1686_s14, %s48_s25  }
  0x34   : > { %s1841_s9 = scalar_lea.hbm %s2211_s0, %s1171_s6  ;;  %s194_s21 = scalar_lea.vmem [#allocation3], %s1126_s4 }
  0x35   : > { %s202_s18 = sshll.u32 %s194_s21, 4  ;;  %p1847_p13 = pnand %p1370_p12, %p1820_p6  ;;  %s1843_s18 = int_to_ptr.vmem [resolvable:$true] %s202_s18 }
  0x36   : > { %s1851_s25 = scalar_lea.sflag [#allocation4], %s190_s26  ;;  %s1582_s30 = scalar_lea.hbm %s1841_s9, 4096 }
  0x37   : > { %p1583_p0 = scmp.ne.s32.totalorder %s1841_s9, %s1582_s30  ;;  %p1584_p3 = pneg %p1847_p13 }
  0x38   : > { %s1587_s29 = scalar_lea.hbm %s2211_s0, 8192  ;;  %p1588_p9 = scmp.lt.u32.totalorder %s1841_s9, %s2211_s0 }
  0x39   : > { %p1585_p5 = pnand %p1584_p3, %p1583_p0  ;;  %p1589_p1 = scmp.lt.u32.totalorder %s1587_s29, %s1582_s30 }
  0x3a   : > { %p1591_p4 = scmp.lt.u32.totalorder %s1582_s30, %s1841_s9 }
  0x3b   : > { %p1586_p7 = pneg %p1585_p5  ;;  %p1590_p2 = por %p1589_p1, %p1588_p9 }
  0x3d   : > { %p1592_p6 = por %p1591_p4, %p1590_p2 }
  0x3f   : > { %p1593_p8 = pnand %p1592_p6, %p1586_p7 }
  0x41   : > { %1596 = shalt.err (!%p1593_p8)
}
  0x42   : > { %s1597_s26 = scalar_lea.vmem %s1843_s18, 4096  ;;  %s1703_s21 = smov [#allocation3]  }
  0x43   : > { %p1598_p12 = scmp.ne.s32.totalorder %s1843_s18, %s1597_s26  ;;  %s1602_s4 = sshll.u32 %s1703_s21, 4  ;;  %s1603_s4 = int_to_ptr.vmem [resolvable:$false] %s1602_s4 }
  0x44   : > { %s1604_s6 = scalar_lea.vmem %s1603_s4, 8192  ;;  %p1605_p5 = scmp.lt.s32.totalorder %s1843_s18, %s1603_s4 }
  0x45   : > { %p1600_p11 = pnand %p1598_p12, %p1584_p3  ;;  %p1606_p9 = scmp.lt.s32.totalorder %s1604_s6, %s1597_s26 }
  0x47   : > { %p1601_p0 = pneg %p1600_p11  ;;  %p1607_p1 = por %p1606_p9, %p1605_p5 }
  0x49   : > { %p1608_p2 = pnand %p1607_p1, %p1601_p0 }
  0x4b   : > { %1611 = shalt.err (!%p1608_p2)
}
  0x4c   : > { %1364 = dma.hbm_to_vmem [thread:$0]  (!%p1847_p13), %s1841_s9, 4096, %s1843_s18, %s1851_s25, %s1701_s10, %s1701_s10, %s1702_s11  }
  0x4d   : > { %p2229_p3 = scmp.ne.s32.totalorder %s2223_s24, 0 }
  0x4e   : > { %s1885_s30 = sand.u32 (!%p2229_p3), 1, %s1682_s13   ;;  %p2230_p7 = scmp.ne.s32.totalorder (!%p2229_p3), %s2221_s22, 0 }
  0x4f   : > { %214 = sbr.rel (%p2229_p3) target bundleno = 439 (0x1b7), region = 32  ;;  %s1130_s29 = sshll.u32 (!%p2229_p3), %s1885_s30, 8 }
  0x50   : > { %s217_s7 = scalar_lea.sflag (!%p2229_p3), [#allocation4], %s1885_s30  ;;  %s1891_s19 = scalar_lea.vmem (!%p2229_p3), [#allocation3], %s1130_s29 }
  0x56   : > { %1665 = dma.done.wait (%p2230_p7), %s217_s7, 4096  }
  0x57   : > { %1667 = vsyncadd (%p2230_p7), %s217_s7, 4294963200  ;;  %p2231_p13 = scmp.ne.s32.totalorder %s2219_s20, 0 }
  0x59   : > { %1669 = dma.done.wait (%p2231_p13), [#allocation7], 2048  }
  0x5a   : > { %1671 = vsyncadd (%p2231_p13), [#allocation7], 4294965248  ;;  %v356_v0 = vld [vmem:[#allocation6] sm:$0xff]  ;;  %v357_v1 = vld [vmem:[#allocation6 + $0x8] sm:$0xff]  ;;  %s2036_s24 = scalar_lea.vmem [#allocation8], %s1130_s29  ;;  %s1172_s10 = sshll.u32 %s1690_s15, 12 }
  0x5b   : > { %v358_v2 = vld [vmem:[#allocation6 + $0x10] sm:$0xff]  ;;  %v1301_v3 = vpack.c.bf16 %v357_v1, %v356_v0  ;;  %v359_v4 = vld [vmem:[#allocation6 + $0x18] sm:$0xff]  ;;  %v360_v6 = vld [vmem:[#allocation6 + $0x20] sm:$0xff]  ;;  %s1006_s11 = sshll.u32 %s2036_s24, 4  ;;  %s2156_s15 = scalar_lea.hbm %s2214_s3, %s1172_s10  ;;  %s2158_s11 = int_to_ptr.vmem [resolvable:$true] %s1006_s11 }
  0x5c   : > { %v1305_v5 = vpack.c.bf16 %v359_v4, %v358_v2  ;;  %v361_v7 = vld [vmem:[#allocation6 + $0x28] sm:$0xff]  ;;  %v324_v9 = vld [vmem:[%s1891_s19] sm:$0xff]  ;;  %v362_v11 = vld [vmem:[#allocation6 + $0x30] sm:$0xff]  ;;  %s992_s25 = scalar_lea.sflag [#allocation5], %s1885_s30  ;;  %s1612_s8 = scalar_lea.vmem %s2158_s11, 4096 }
  0x5d   : > { %1302 = vmatprep.subr.bf16.mxu0 %v1301_v3  ;;  %1333 = vmatprep.subr.bf16.mxu1 %v1301_v3  ;;  %v1309_v8 = vpack.c.bf16 %v361_v7, %v360_v6  ;;  %v340_v10 = vld [vmem:[%s1891_s19 + $0x80] sm:$0xff]  ;;  %v363_v12 = vld [vmem:[#allocation6 + $0x38] sm:$0xff]  ;;  %v365_v15 = vld [vmem:[#allocation6 + $0x48] sm:$0xff]  ;;  %p1613_p4 = scmp.ne.s32.totalorder %s2158_s11, %s1612_s8  ;;  %s1704_s26 = smov [#allocation8]  }
  0x5e   : > { %1304 = vmatpush3.bf16.msra.mxu0 %v1301_v3  ;;  %1341 = vmatpush3.bf16.msra.mxu1 %v1301_v3  ;;  %v1313_v13 = vpack.c.bf16 %v363_v12, %v362_v11  ;;  %v364_v14 = vld [vmem:[#allocation6 + $0x40] sm:$0xff]  ;;  %v366_v17 = vld [vmem:[#allocation6 + $0x50] sm:$0xff]  ;;  %v367_v18 = vld [vmem:[#allocation6 + $0x58] sm:$0xff]  ;;  %s1616_s21 = sshll.u32 %s1704_s26, 4  ;;  %s1617_s21 = int_to_ptr.vmem [resolvable:$false] %s1616_s21 }
  0x5f   : > { %1306 = vmatprep.subr.bf16.mxu0 %v1305_v5  ;;  %1334 = vmatprep.subr.bf16.mxu1 %v1305_v5  ;;  %v1317_v16 = vpack.c.bf16 %v365_v15, %v364_v14  ;;  %v1321_v19 = vpack.c.bf16 %v367_v18, %v366_v17  ;;  %v368_v20 = vld [vmem:[#allocation6 + $0x60] sm:$0xff]  ;;  %v369_v21 = vld [vmem:[#allocation6 + $0x68] sm:$0xff]  ;;  %v370_v23 = vld [vmem:[#allocation6 + $0x70] sm:$0xff]  ;;  %p1614_p6 = pnand %p1613_p4, %p1826_p10  ;;  %s1618_s4 = scalar_lea.vmem %s1617_s21, 8192 }
  0x60   : > { %1253 = vmatprep.mubr.f32.mxu0 %v324_v9  ;;  %1277 = vmatprep.mubr.f32.mxu1 %v340_v10  ;;  %v1325_v22 = vpack.c.bf16 %v369_v21, %v368_v20  ;;  %v371_v24 = vld [vmem:[#allocation6 + $0x78] sm:$0xff]  ;;  %v325_v26 = vld [vmem:[%s1891_s19 + $0x8] sm:$0xff]  ;;  %v326_v28 = vld [vmem:[%s1891_s19 + $0x10] sm:$0xff]  ;;  %p1619_p12 = scmp.lt.s32.totalorder %s2158_s11, %s1617_s21  ;;  %p1620_p11 = scmp.lt.s32.totalorder %s1618_s4, %s1612_s8 }
  0x61   : > { %v1329_v25 = vpack.c.bf16 %v371_v24, %v370_v23  ;;  %v341_v27 = vld [vmem:[%s1891_s19 + $0x88] sm:$0xff]  ;;  %v342_v29 = vld [vmem:[%s1891_s19 + $0x90] sm:$0xff]  ;;  %v327_v30 = vld [vmem:[%s1891_s19 + $0x18] sm:$0xff]  ;;  %p1615_p8 = pneg %p1614_p6 }
  0x62   : > { %1308 = vmatpush3.bf16.msra.mxu0 %v1305_v5  ;;  %1342 = vmatpush3.bf16.msra.mxu1 %v1305_v5  ;;  %v343_v31 = vld [vmem:[%s1891_s19 + $0x98] sm:$0xff]  ;;  %v328_v32 = vld [vmem:[%s1891_s19 + $0x20] sm:$0xff]  ;;  %v329_v34 = vld [vmem:[%s1891_s19 + $0x28] sm:$0xff]  ;;  %p1621_p0 = por %p1620_p11, %p1619_p12 }
  0x63   : > { %1310 = vmatprep.subr.bf16.mxu0 %v1309_v8  ;;  %1335 = vmatprep.subr.bf16.mxu1 %v1309_v8  ;;  %v344_v33 = vld [vmem:[%s1891_s19 + $0xa0] sm:$0xff]  ;;  %v345_v35 = vld [vmem:[%s1891_s19 + $0xa8] sm:$0xff]  ;;  %v330_v36 = vld [vmem:[%s1891_s19 + $0x30] sm:$0xff] }
  0x64   : > { %v346_v37 = vld [vmem:[%s1891_s19 + $0xb0] sm:$0xff]  ;;  %v331_v38 = vld [vmem:[%s1891_s19 + $0x38] sm:$0xff]  ;;  %v332_v40 = vld [vmem:[%s1891_s19 + $0x40] sm:$0xff]  ;;  %p1622_p5 = pnand %p1621_p0, %p1615_p8 }
  0x65   : > { %v347_v39 = vld [vmem:[%s1891_s19 + $0xb8] sm:$0xff]  ;;  %v348_v41 = vld [vmem:[%s1891_s19 + $0xc0] sm:$0xff]  ;;  %v333_v42 = vld [vmem:[%s1891_s19 + $0x48] sm:$0xff] }
  0x66   : > { %1312 = vmatpush3.bf16.msra.mxu0 %v1309_v8  ;;  %1343 = vmatpush3.bf16.msra.mxu1 %v1309_v8  ;;  %v349_v43 = vld [vmem:[%s1891_s19 + $0xc8] sm:$0xff]  ;;  %v334_v44 = vld [vmem:[%s1891_s19 + $0x50] sm:$0xff]  ;;  %v335_v46 = vld [vmem:[%s1891_s19 + $0x58] sm:$0xff] }
  0x67   : > { %1314 = vmatprep.subr.bf16.mxu0 %v1313_v13  ;;  %1336 = vmatprep.subr.bf16.mxu1 %v1313_v13  ;;  %v350_v45 = vld [vmem:[%s1891_s19 + $0xd0] sm:$0xff]  ;;  %v351_v47 = vld [vmem:[%s1891_s19 + $0xd8] sm:$0xff]  ;;  %v336_v48 = vld [vmem:[%s1891_s19 + $0x60] sm:$0xff] }
  0x68   : > { %v352_v49 = vld [vmem:[%s1891_s19 + $0xe0] sm:$0xff]  ;;  %v337_v50 = vld [vmem:[%s1891_s19 + $0x68] sm:$0xff]  ;;  %v338_v52 = vld [vmem:[%s1891_s19 + $0x70] sm:$0xff] }
  0x69   : > { %v353_v51 = vld [vmem:[%s1891_s19 + $0xe8] sm:$0xff]  ;;  %v354_v53 = vld [vmem:[%s1891_s19 + $0xf0] sm:$0xff]  ;;  %v339_v54 = vld [vmem:[%s1891_s19 + $0x78] sm:$0xff] }
  0x6a   : > { %1316 = vmatpush3.bf16.msra.mxu0 %v1313_v13  ;;  %1344 = vmatpush3.bf16.msra.mxu1 %v1313_v13  ;;  %v355_v55 = vld [vmem:[%s1891_s19 + $0xf8] sm:$0xff]  ;;  %v1936_v56 = vld [vmem:[%s2213_s2] ss:$0 sm:$0xff] }
  0x6b   : > { %1318 = vmatprep.subr.bf16.mxu0 %v1317_v16  ;;  %1337 = vmatprep.subr.bf16.mxu1 %v1317_v16 }
  0x6e   : > { %1320 = vmatpush3.bf16.msra.mxu0 %v1317_v16  ;;  %1345 = vmatpush3.bf16.msra.mxu1 %v1317_v16 }
  0x6f   : > { %1322 = vmatprep.subr.bf16.mxu0 %v1321_v19  ;;  %1338 = vmatprep.subr.bf16.mxu1 %v1321_v19 }
  0x72   : > { %1324 = vmatpush3.bf16.msra.mxu0 %v1321_v19  ;;  %1346 = vmatpush3.bf16.msra.mxu1 %v1321_v19 }
  0x73   : > { %1326 = vmatprep.subr.bf16.mxu0 %v1325_v22  ;;  %1339 = vmatprep.subr.bf16.mxu1 %v1325_v22 }
  0x76   : > { %1328 = vmatpush3.bf16.msra.mxu0 %v1325_v22  ;;  %1347 = vmatpush3.bf16.msra.mxu1 %v1325_v22 }
  0x77   : > { %1330 = vmatprep.subr.bf16.mxu0 %v1329_v25  ;;  %1340 = vmatprep.subr.bf16.mxu1 %v1329_v25 }
  0x7a   : > { %1332 = vmatpush3.bf16.msra.mxu0 %v1329_v25  ;;  %1348 = vmatpush3.bf16.msra.mxu1 %v1329_v25 }
  0x7d   : > { %1254 = vmatmul.mubr.f32.vlgmr.msra.gmra.mrb[0].mxu0 %v325_v26  ;;  %1278 = vmatmul.mubr.f32.vlgmr.msra.gmra.mrb[0].mxu1 %v341_v27 }
  0x7e   : > { %1256 = vmatprep.mubr.f32.mxu0 %v326_v28  ;;  %1280 = vmatprep.mubr.f32.mxu1 %v342_v29 }
  0x81   : > { %1257 = vmatmul.mubr.f32.gmra.mrb[2].mxu0 %v327_v30  ;;  %1281 = vmatmul.mubr.f32.gmra.mrb[2].mxu1 %v343_v31 }
  0x82   : > { %1259 = vmatprep.mubr.f32.mxu0 %v328_v32  ;;  %1283 = vmatprep.mubr.f32.mxu1 %v344_v33 }
  0x85   : > { %1260 = vmatmul.mubr.f32.gmra.mrb[4].mxu0 %v329_v34  ;;  %1284 = vmatmul.mubr.f32.gmra.mrb[4].mxu1 %v345_v35 }
  0x86   : > { %1262 = vmatprep.mubr.f32.mxu0 %v330_v36  ;;  %1286 = vmatprep.mubr.f32.mxu1 %v346_v37 }
  0x89   : > { %1263 = vmatmul.mubr.f32.gmra.mrb[6].mxu0 %v331_v38  ;;  %1287 = vmatmul.mubr.f32.gmra.mrb[6].mxu1 %v347_v39 }
  0x8a   : > { %1265 = vmatprep.mubr.f32.mxu0 %v332_v40  ;;  %1289 = vmatprep.mubr.f32.mxu1 %v348_v41 }
  0x8d   : > { %1266 = vmatmul.mubr.f32.gmra.mrb[8].mxu0 %v333_v42  ;;  %1290 = vmatmul.mubr.f32.gmra.mrb[8].mxu1 %v349_v43 }
  0x8e   : > { %1268 = vmatprep.mubr.f32.mxu0 %v334_v44  ;;  %1292 = vmatprep.mubr.f32.mxu1 %v350_v45 }
  0x91   : > { %1269 = vmatmul.mubr.f32.gmra.mrb[10].mxu0 %v335_v46  ;;  %1293 = vmatmul.mubr.f32.gmra.mrb[10].mxu1 %v351_v47 }
  0x92   : > { %1271 = vmatprep.mubr.f32.mxu0 %v336_v48  ;;  %1295 = vmatprep.mubr.f32.mxu1 %v352_v49 }
  0x95   : > { %1272 = vmatmul.mubr.f32.gmra.mrb[12].mxu0 %v337_v50  ;;  %1296 = vmatmul.mubr.f32.gmra.mrb[12].mxu1 %v353_v51 }
  0x96   : > { %1274 = vmatprep.mubr.f32.mxu0 %v338_v52  ;;  %1298 = vmatprep.mubr.f32.mxu1 %v354_v53 }
  0x99   : > { %1275 = vmatmul.mubr.f32.gmra.mrb[14].mxu0 %v339_v54  ;;  %1299 = vmatmul.mubr.f32.gmra.mrb[14].mxu1 %v355_v55 }
 0x150   : > { %v1255_v57 = vpop.f32.mrb[0].mxu0  ;;  %v1279_v58 = vpop.f32.mrb[0].mxu1 }
 0x151   : > { %v1939_v59 = vadd.f32 %v1255_v57, %v1936_v56  ;;  %v1942_v60 = vadd.f32 %v1279_v58, %v1936_v56  ;;  %v438_v61 = vpop.f32.mrb[1].mxu0  ;;  %v518_v62 = vpop.f32.mrb[1].mxu1 }
 0x152   : > { %v1945_v63 = vadd.f32 %v1936_v56, %v438_v61  ;;  %v1948_v0 = vadd.f32 %v1936_v56, %v518_v62 }
 0x153   : > { %v1135_v1 = vmul.f32 -1.442695, %v1939_v59  ;;  %v1151_v2 = vmul.f32 -1.442695, %v1942_v60 }
 0x154   : > { %v1134_v3 = vmul.f32 -1.442695, %v1945_v63  ;;  %v1150_v4 = vmul.f32 -1.442695, %v1948_v0  ;;  %v1258_v5 = vpop.f32.mrb[2].mxu0  ;;  %v1282_v6 = vpop.f32.mrb[2].mxu1 }
 0x155   : > { %1426 = vpow2.f32 %v1135_v1  ;;  %v1955_v7 = vadd.f32 %v1258_v5, %v1936_v56  ;;  %v1958_v8 = vadd.f32 %v1282_v6, %v1936_v56  ;;  %v448_v9 = vpop.f32.mrb[3].mxu0  ;;  %v528_v10 = vpop.f32.mrb[3].mxu1 }
 0x156   : > { %1428 = vpow2.f32 %v1151_v2  ;;  %v1961_v11 = vadd.f32 %v1936_v56, %v448_v9  ;;  %v1964_v12 = vadd.f32 %v1936_v56, %v528_v10 }
 0x157   : > { %1430 = vpow2.f32 %v1134_v3  ;;  %v1137_v13 = vmul.f32 -1.442695, %v1955_v7  ;;  %v1153_v14 = vmul.f32 -1.442695, %v1958_v8 }
 0x158   : > { %1432 = vpow2.f32 %v1150_v4  ;;  %v1136_v15 = vmul.f32 -1.442695, %v1961_v11  ;;  %v1152_v16 = vmul.f32 -1.442695, %v1964_v12  ;;  %v1261_v17 = vpop.f32.mrb[4].mxu0  ;;  %v1285_v18 = vpop.f32.mrb[4].mxu1 }
 0x159   : > { %1434 = vpow2.f32 %v1137_v13  ;;  %v1971_v19 = vadd.f32 %v1261_v17, %v1936_v56  ;;  %v1974_v20 = vadd.f32 %v1285_v18, %v1936_v56  ;;  %v458_v21 = vpop.f32.mrb[5].mxu0  ;;  %v538_v22 = vpop.f32.mrb[5].mxu1 }
 0x15a   : > { %1436 = vpow2.f32 %v1153_v14  ;;  %v1977_v23 = vadd.f32 %v1936_v56, %v458_v21  ;;  %v1980_v24 = vadd.f32 %v1936_v56, %v538_v22 }
 0x15b   : > { %1438 = vpow2.f32 %v1136_v15  ;;  %v1139_v25 = vmul.f32 -1.442695, %v1971_v19  ;;  %v1155_v26 = vmul.f32 -1.442695, %v1974_v20 }
 0x15c   : > { %1440 = vpow2.f32 %v1152_v16  ;;  %v1138_v27 = vmul.f32 -1.442695, %v1977_v23  ;;  %v1154_v28 = vmul.f32 -1.442695, %v1980_v24  ;;  %v1264_v29 = vpop.f32.mrb[6].mxu0  ;;  %v1288_v30 = vpop.f32.mrb[6].mxu1 }
 0x15d   : > { %1442 = vpow2.f32 %v1139_v25  ;;  %v1987_v31 = vadd.f32 %v1264_v29, %v1936_v56  ;;  %v468_v32 = vpop.f32.mrb[7].mxu0  ;;  %v548_v33 = vpop.f32.mrb[7].mxu1  ;;  %v1993_v1 = vadd.f32 %v1288_v30, %v1936_v56 }
 0x15e   : > { %1444 = vpow2.f32 %v1155_v26  ;;  %v1996_v4 = vadd.f32 %v1936_v56, %v468_v32  ;;  %v1999_v10 = vadd.f32 %v1936_v56, %v548_v33 }
 0x15f   : > { %v1427_v34 = vpop.eup %1426  ;;  %1446 = vpow2.f32 %v1138_v27  ;;  %v1141_v35 = vmul.f32 -1.442695, %v1987_v31  ;;  %v1157_v25 = vmul.f32 -1.442695, %v1993_v1 }
 0x160   : > { %v1429_v36 = vpop.eup %1428  ;;  %v832_v37 = vadd.f32 1.0, %v1427_v34  ;;  %1448 = vpow2.f32 %v1154_v28  ;;  %v1267_v38 = vpop.f32.mrb[8].mxu0  ;;  %v1140_v29 = vmul.f32 -1.442695, %v1996_v4 }
 0x161   : > { %v1431_v39 = vpop.eup %1430  ;;  %v848_v40 = vadd.f32 1.0, %v1429_v36  ;;  %1450 = vpow2.f32 %v1141_v35  ;;  %v1291_v41 = vpop.f32.mrb[8].mxu1  ;;  %v2004_v17 = vadd.f32 %v1267_v38, %v1936_v56  ;;  %v1156_v35 = vmul.f32 -1.442695, %v1999_v10 }
 0x162   : > { %v478_v42 = vpop.f32.mrb[9].mxu0  ;;  %v1433_v43 = vpop.eup %1432  ;;  %1452 = vrcp.f32 %v832_v37  ;;  %v831_v44 = vadd.f32 1.0, %v1431_v39  ;;  %v2010_v26 = vadd.f32 %v1291_v41, %v1936_v56 }
 0x163   : > { %v558_v45 = vpop.f32.mrb[9].mxu1  ;;  %v1435_v46 = vpop.eup %1434  ;;  %1454 = vrcp.f32 %v848_v40  ;;  %v847_v47 = vadd.f32 1.0, %v1433_v43  ;;  %v2014_v30 = vadd.f32 %v1936_v56, %v478_v42  ;;  %v1143_v41 = vmul.f32 -1.442695, %v2004_v17 }
 0x164   : > { %v1437_v48 = vpop.eup %1436  ;;  %1456 = vrcp.f32 %v831_v44  ;;  %v834_v49 = vadd.f32 1.0, %v1435_v46  ;;  %v1270_v50 = vpop.f32.mrb[10].mxu0  ;;  %v2021_v36 = vadd.f32 %v1936_v56, %v558_v45 }
 0x165   : > { %v1439_v51 = vpop.eup %1438  ;;  %1458 = vrcp.f32 %v847_v47  ;;  %v850_v52 = vadd.f32 1.0, %v1437_v48  ;;  %v1294_v53 = vpop.f32.mrb[10].mxu1  ;;  %v2030_v42 = vadd.f32 %v1270_v50, %v1936_v56  ;;  %v1142_v48 = vmul.f32 -1.442695, %v2014_v30 }
 0x166   : > { %v488_v54 = vpop.f32.mrb[11].mxu0  ;;  %v1441_v55 = vpop.eup %1440  ;;  %1460 = vrcp.f32 %v834_v49  ;;  %v833_v57 = vadd.f32 1.0, %v1439_v51  ;;  %v2042_v45 = vadd.f32 %v1294_v53, %v1936_v56  ;;  %v1158_v51 = vmul.f32 -1.442695, %v2021_v36 }
 0x167   : > { %v1990_v58 = vpop.f32.mrb[11].mxu1  ;;  %v1443_v61 = vpop.eup %1442  ;;  %1462 = vrcp.f32 %v850_v52  ;;  %v849_v62 = vadd.f32 1.0, %v1441_v55  ;;  %v2048_v49 = vadd.f32 %v1936_v56, %v488_v54  ;;  %v1145_v54 = vmul.f32 -1.442695, %v2030_v42 }
 0x168   : > { %v1445_v2 = vpop.eup %1444  ;;  %1464 = vrcp.f32 %v833_v57  ;;  %v836_v3 = vadd.f32 1.0, %v1443_v61  ;;  %v1273_v5 = vpop.f32.mrb[12].mxu0  ;;  %v2055_v52 = vadd.f32 %v1936_v56, %v1990_v58  ;;  %v1161_v58 = vmul.f32 -1.442695, %v2042_v45 }
 0x169   : > { %v1447_v6 = vpop.eup %1446  ;;  %1466 = vrcp.f32 %v849_v62  ;;  %v852_v9 = vadd.f32 1.0, %v1445_v2  ;;  %v1297_v13 = vpop.f32.mrb[12].mxu1  ;;  %v2061_v55 = vadd.f32 %v1273_v5, %v1936_v56  ;;  %v1144_v2 = vmul.f32 -1.442695, %v2048_v49 }
 0x16a   : > { %v2001_v14 = vpop.f32.mrb[13].mxu0  ;;  %v1449_v15 = vpop.eup %1448  ;;  %1468 = vrcp.f32 %v836_v3  ;;  %v835_v16 = vadd.f32 1.0, %v1447_v6  ;;  %v2067_v61 = vadd.f32 %v1297_v13, %v1936_v56 }
 0x16b   : > { %v2006_v18 = vpop.f32.mrb[13].mxu1  ;;  %v1451_v21 = vpop.eup %1450  ;;  %1470 = vrcp.f32 %v852_v9  ;;  %v851_v22 = vadd.f32 1.0, %v1449_v15 }
 0x16c   : > { %v1453_v27 = vpop.eup %1452  ;;  %1472 = vrcp.f32 %v835_v16  ;;  %v838_v28 = vadd.f32 1.0, %v1451_v21  ;;  %v2016_v32 = vpop.f32.mrb[14].mxu0 }
 0x16d   : > { %v1455_v33 = vpop.eup %1454  ;;  %v928_v34 = vmul.f32 %v1453_v27, %v1939_v59  ;;  %1474 = vrcp.f32 %v851_v22  ;;  %v2023_v37 = vpop.f32.mrb[14].mxu1 }
 0x16e   : > { %v2025_v38 = vpop.f32.mrb[15].mxu0  ;;  %v1457_v39 = vpop.eup %1456  ;;  %v944_v40 = vmul.f32 %v1455_v33, %v1942_v60  ;;  %1476 = vrcp.f32 %v838_v28  ;;  %v1159_v60 = vmul.f32 -1.442695, %v2010_v26 }
 0x16f   : > { %v2032_v59 = vpop.f32.mrb[15].mxu1  ;;  %v1459_v43 = vpop.eup %1458  ;;  %960 = vst [vmem:[%s2036_s24 + $0x8] sm:$0xff] %v928_v34  ;;  %v927_v44 = vmul.f32 %v1457_v39, %v1945_v63  ;;  %1478 = vpow2.f32 %v1157_v25 }
 0x170   : > { %v1461_v46 = vpop.eup %1460  ;;  %976 = vst [vmem:[%s2036_s24 + $0x88] sm:$0xff] %v944_v40  ;;  %v943_v47 = vmul.f32 %v1459_v43, %v1948_v0  ;;  %1480 = vpow2.f32 %v1140_v29 }
 0x171   : > { %v1463_v50 = vpop.eup %1462  ;;  %959 = vst [vmem:[%s2036_s24] sm:$0xff] %v927_v44  ;;  %v930_v63 = vmul.f32 %v1461_v46, %v1955_v7  ;;  %1482 = vpow2.f32 %v1156_v35  ;;  %v2089_v46 = vadd.f32 %v1936_v56, %v2001_v14  ;;  %v2101_v14 = vadd.f32 %v2023_v37, %v1936_v56 }
 0x172   : > { %v1465_v0 = vpop.eup %1464  ;;  %975 = vst [vmem:[%s2036_s24 + $0x80] sm:$0xff] %v943_v47  ;;  %v946_v53 = vmul.f32 %v1463_v50, %v1958_v8  ;;  %1484 = vpow2.f32 %v1143_v41  ;;  %v2093_v50 = vadd.f32 %v1936_v56, %v2006_v18  ;;  %v2111_v37 = vadd.f32 %v1936_v56, %v2032_v59 }
 0x173   : > { %v1467_v7 = vpop.eup %1466  ;;  %962 = vst [vmem:[%s2036_s24 + $0x18] sm:$0xff] %v930_v63  ;;  %v929_v57 = vmul.f32 %v1465_v0, %v1961_v11  ;;  %1486 = vpow2.f32 %v1159_v60  ;;  %v1160_v11 = vmul.f32 -1.442695, %v2055_v52  ;;  %v2097_v0 = vadd.f32 %v2016_v32, %v1936_v56 }
 0x174   : > { %v1469_v62 = vpop.eup %1468  ;;  %978 = vst [vmem:[%s2036_s24 + $0x98] sm:$0xff] %v946_v53  ;;  %v945_v8 = vmul.f32 %v1467_v7, %v1964_v12  ;;  %1488 = vpow2.f32 %v1142_v48  ;;  %v1147_v12 = vmul.f32 -1.442695, %v2061_v55  ;;  %v1146_v18 = vmul.f32 -1.442695, %v2089_v46 }
 0x175   : > { %v1471_v3 = vpop.eup %1470  ;;  %961 = vst [vmem:[%s2036_s24 + $0x10] sm:$0xff] %v929_v57  ;;  %v932_v5 = vmul.f32 %v1469_v62, %v1971_v19  ;;  %1490 = vpow2.f32 %v1158_v51  ;;  %v1163_v19 = vmul.f32 -1.442695, %v2067_v61 }
 0x176   : > { %v1473_v6 = vpop.eup %1472  ;;  %977 = vst [vmem:[%s2036_s24 + $0x90] sm:$0xff] %v945_v8  ;;  %v948_v9 = vmul.f32 %v1471_v3, %v1974_v20  ;;  %1492 = vpow2.f32 %v1145_v54  ;;  %v1162_v8 = vmul.f32 -1.442695, %v2093_v50 }
 0x177   : > { %v1475_v13 = vpop.eup %1474  ;;  %964 = vst [vmem:[%s2036_s24 + $0x28] sm:$0xff] %v932_v5  ;;  %v931_v15 = vmul.f32 %v1473_v6, %v1977_v23  ;;  %1494 = vpow2.f32 %v1161_v58  ;;  %v2106_v58 = vadd.f32 %v1936_v56, %v2025_v38  ;;  %v1149_v5 = vmul.f32 -1.442695, %v2097_v0 }
 0x178   : > { %v1477_v16 = vpop.eup %1476  ;;  %980 = vst [vmem:[%s2036_s24 + $0xa8] sm:$0xff] %v948_v9  ;;  %v947_v21 = vmul.f32 %v1475_v13, %v1980_v24  ;;  %1496 = vpow2.f32 %v1144_v2  ;;  %v1165_v6 = vmul.f32 -1.442695, %v2101_v14 }
 0x179   : > { %v1479_v22 = vpop.eup %1478  ;;  %963 = vst [vmem:[%s2036_s24 + $0x20] sm:$0xff] %v931_v15  ;;  %v934_v20 = vmul.f32 %v1477_v16, %v1987_v31  ;;  %1498 = vpow2.f32 %v1160_v11  ;;  %v1148_v56 = vmul.f32 -1.442695, %v2106_v58 }
 0x17a   : > { %v1481_v25 = vpop.eup %1480  ;;  %979 = vst [vmem:[%s2036_s24 + $0xa0] sm:$0xff] %v947_v21  ;;  %v854_v27 = vadd.f32 1.0, %v1479_v22  ;;  %1500 = vpow2.f32 %v1147_v12 }
 0x17b   : > { %v1483_v28 = vpop.eup %1482  ;;  %966 = vst [vmem:[%s2036_s24 + $0x38] sm:$0xff] %v934_v20  ;;  %v837_v23 = vadd.f32 1.0, %v1481_v25  ;;  %1502 = vpow2.f32 %v1163_v19 }
 0x17c   : > { %v1485_v29 = vpop.eup %1484  ;;  %1504 = vrcp.f32 %v854_v27  ;;  %v853_v33 = vadd.f32 1.0, %v1483_v28 }
 0x17d   : > { %v1487_v34 = vpop.eup %1486  ;;  %1506 = vrcp.f32 %v837_v23  ;;  %v840_v24 = vadd.f32 1.0, %v1485_v29 }
 0x17e   : > { %v1489_v35 = vpop.eup %1488  ;;  %1508 = vrcp.f32 %v853_v33  ;;  %v856_v39 = vadd.f32 1.0, %v1487_v34 }
 0x17f   : > { %v1491_v40 = vpop.eup %1490  ;;  %1510 = vrcp.f32 %v840_v24  ;;  %v839_v31 = vadd.f32 1.0, %v1489_v35 }
 0x180   : > { %v1493_v41 = vpop.eup %1492  ;;  %1512 = vrcp.f32 %v856_v39  ;;  %v855_v43 = vadd.f32 1.0, %v1491_v40 }
 0x181   : > { %v1495_v44 = vpop.eup %1494  ;;  %1514 = vrcp.f32 %v839_v31  ;;  %v842_v60 = vadd.f32 1.0, %v1493_v41 }
 0x182   : > { %v1497_v47 = vpop.eup %1496  ;;  %1516 = vrcp.f32 %v855_v43  ;;  %v858_v48 = vadd.f32 1.0, %v1495_v44 }
 0x183   : > { %v1499_v63 = vpop.eup %1498  ;;  %1518 = vrcp.f32 %v842_v60  ;;  %v841_v51 = vadd.f32 1.0, %v1497_v47 }
 0x184   : > { %v1501_v53 = vpop.eup %1500  ;;  %1520 = vrcp.f32 %v858_v48  ;;  %v857_v54 = vadd.f32 1.0, %v1499_v63 }
 0x185   : > { %v1503_v7 = vpop.eup %1502  ;;  %1522 = vrcp.f32 %v841_v51  ;;  %v844_v57 = vadd.f32 1.0, %v1501_v53 }
 0x186   : > { %v1505_v62 = vpop.eup %1504  ;;  %1524 = vrcp.f32 %v857_v54  ;;  %v860_v32 = vadd.f32 1.0, %v1503_v7 }
 0x187   : > { %v1507_v2 = vpop.eup %1506  ;;  %v950_v3 = vmul.f32 %v1505_v62, %v1993_v1  ;;  %1526 = vrcp.f32 %v844_v57 }
 0x188   : > { %v1509_v11 = vpop.eup %1508  ;;  %v933_v38 = vmul.f32 %v1507_v2, %v1996_v4  ;;  %1528 = vrcp.f32 %v860_v32  ;;  %v1164_v4 = vmul.f32 -1.442695, %v2111_v37 }
 0x189   : > { %v1511_v9 = vpop.eup %1510  ;;  %982 = vst [vmem:[%s2036_s24 + $0xb8] sm:$0xff] %v950_v3  ;;  %v949_v12 = vmul.f32 %v1509_v11, %v1999_v10  ;;  %1530 = vpow2.f32 %v1146_v18 }
 0x18a   : > { %v1513_v1 = vpop.eup %1512  ;;  %965 = vst [vmem:[%s2036_s24 + $0x30] sm:$0xff] %v933_v38  ;;  %v936_v59 = vmul.f32 %v1511_v9, %v2004_v17  ;;  %1532 = vpow2.f32 %v1162_v8 }
 0x18b   : > { %v1515_v13 = vpop.eup %1514  ;;  %981 = vst [vmem:[%s2036_s24 + $0xb0] sm:$0xff] %v949_v12  ;;  %v952_v15 = vmul.f32 %v1513_v1, %v2010_v26  ;;  %1534 = vpow2.f32 %v1149_v5 }
 0x18c   : > { %v1517_v19 = vpop.eup %1516  ;;  %968 = vst [vmem:[%s2036_s24 + $0x48] sm:$0xff] %v936_v59  ;;  %v935_v10 = vmul.f32 %v1515_v13, %v2014_v30  ;;  %1536 = vpow2.f32 %v1165_v6 }
 0x18d   : > { %v1519_v16 = vpop.eup %1518  ;;  %984 = vst [vmem:[%s2036_s24 + $0xc8] sm:$0xff] %v952_v15  ;;  %v951_v17 = vmul.f32 %v1517_v19, %v2021_v36  ;;  %1538 = vpow2.f32 %v1148_v56 }
 0x18e   : > { %v1521_v21 = vpop.eup %1520  ;;  %967 = vst [vmem:[%s2036_s24 + $0x40] sm:$0xff] %v935_v10  ;;  %v938_v22 = vmul.f32 %v1519_v16, %v2030_v42  ;;  %1540 = vpow2.f32 %v1164_v4 }
 0x18f   : > { %v1523_v26 = vpop.eup %1522  ;;  %983 = vst [vmem:[%s2036_s24 + $0xc0] sm:$0xff] %v951_v17  ;;  %v954_v20 = vmul.f32 %v1521_v21, %v2042_v45 }
 0x190   : > { %v1525_v30 = vpop.eup %1524  ;;  %970 = vst [vmem:[%s2036_s24 + $0x58] sm:$0xff] %v938_v22  ;;  %v937_v25 = vmul.f32 %v1523_v26, %v2048_v49 }
 0x191   : > { %v1527_v27 = vpop.eup %1526  ;;  %986 = vst [vmem:[%s2036_s24 + $0xd8] sm:$0xff] %v954_v20  ;;  %v953_v36 = vmul.f32 %v1525_v30, %v2055_v52 }
 0x192   : > { %v1529_v28 = vpop.eup %1528  ;;  %969 = vst [vmem:[%s2036_s24 + $0x50] sm:$0xff] %v937_v25  ;;  %v940_v23 = vmul.f32 %v1527_v27, %v2061_v55 }
 0x193   : > { %v1531_v42 = vpop.eup %1530  ;;  %985 = vst [vmem:[%s2036_s24 + $0xd0] sm:$0xff] %v953_v36  ;;  %v956_v29 = vmul.f32 %v1529_v28, %v2067_v61 }
 0x194   : > { %v1533_v33 = vpop.eup %1532  ;;  %972 = vst [vmem:[%s2036_s24 + $0x68] sm:$0xff] %v940_v23  ;;  %v843_v45 = vadd.f32 1.0, %v1531_v42 }
 0x195   : > { %v1535_v34 = vpop.eup %1534  ;;  %988 = vst [vmem:[%s2036_s24 + $0xe8] sm:$0xff] %v956_v29  ;;  %v859_v24 = vadd.f32 1.0, %v1533_v33 }
 0x196   : > { %v1537_v35 = vpop.eup %1536  ;;  %1542 = vrcp.f32 %v843_v45  ;;  %v846_v49 = vadd.f32 1.0, %v1535_v34 }
 0x197   : > { %v1539_v39 = vpop.eup %1538  ;;  %1544 = vrcp.f32 %v859_v24  ;;  %v862_v52 = vadd.f32 1.0, %v1537_v35 }
 0x198   : > { %v1541_v55 = vpop.eup %1540  ;;  %1546 = vrcp.f32 %v846_v49  ;;  %v845_v40 = vadd.f32 1.0, %v1539_v39 }
 0x199   : > { %1548 = vrcp.f32 %v862_v52  ;;  %v861_v61 = vadd.f32 1.0, %v1541_v55 }
 0x19a   : > { %1550 = vrcp.f32 %v845_v40 }
 0x19b   : > { %1552 = vrcp.f32 %v861_v61 }
 0x1a0   : > { %v1543_v31 = vpop.eup %1542 }
 0x1a1   : > { %v1545_v41 = vpop.eup %1544  ;;  %v939_v43 = vmul.f32 %v1543_v31, %v2089_v46 }
 0x1a2   : > { %v1547_v44 = vpop.eup %1546  ;;  %v955_v60 = vmul.f32 %v1545_v41, %v2093_v50 }
 0x1a3   : > { %v1549_v47 = vpop.eup %1548  ;;  %971 = vst [vmem:[%s2036_s24 + $0x60] sm:$0xff] %v939_v43  ;;  %v942_v48 = vmul.f32 %v1547_v44, %v2097_v0 }
 0x1a4   : > { %v1551_v63 = vpop.eup %1550  ;;  %987 = vst [vmem:[%s2036_s24 + $0xe0] sm:$0xff] %v955_v60  ;;  %v958_v51 = vmul.f32 %v1549_v47, %v2101_v14 }
 0x1a5   : > { %v1553_v53 = vpop.eup %1552  ;;  %974 = vst [vmem:[%s2036_s24 + $0x78] sm:$0xff] %v942_v48  ;;  %v941_v46 = vmul.f32 %v1551_v63, %v2106_v58 }
 0x1a6   : > { %990 = vst [vmem:[%s2036_s24 + $0xf8] sm:$0xff] %v958_v51  ;;  %v957_v50 = vmul.f32 %v1553_v53, %v2111_v37 }
 0x1a7   : > { %973 = vst [vmem:[%s2036_s24 + $0x70] sm:$0xff] %v941_v46 }
 0x1a8   : > { %989 = vst [vmem:[%s2036_s24 + $0xf0] sm:$0xff] %v957_v50 }
 0x1a9   : > { %1625 = shalt.err (!%p1622_p5)
}
 0x1aa   : > { %s1626_s6 = scalar_lea.hbm %s2156_s15, 4096  ;;  %s1630_s19 = scalar_lea.hbm %s2214_s3, 8192 }
 0x1ab   : > { %p1627_p9 = scmp.ne.s32.totalorder %s2156_s15, %s1626_s6  ;;  %p1631_p3 = scmp.lt.u32.totalorder %s2156_s15, %s2214_s3 }
 0x1ac   : > { %p1632_p7 = scmp.lt.u32.totalorder %s1630_s19, %s1626_s6  ;;  %p1634_p4 = scmp.lt.u32.totalorder %s1626_s6, %s2156_s15 }
 0x1ad   : > { %p1628_p1 = pnand %p1627_p9, %p1826_p10 }
 0x1ae   : > { %p1633_p13 = por %p1632_p7, %p1631_p3 }
 0x1af   : > { %p1629_p2 = pneg %p1628_p1 }
 0x1b0   : > { %p1635_p6 = por %p1634_p4, %p1633_p13 }
 0x1b2   : > { %p1636_p8 = pnand %p1635_p6, %p1629_p2 }
 0x1b4   : > { %1639 = shalt.err (!%p1636_p8)
}
 0x1b5   : > { %s1705_s24 = smov 128   ;;  %s1706_s10 = smov 8  }
 0x1b6   : > { %1355 = dma.vmem_to_hbm [thread:$0]  (%p1826_p10), %s2158_s11, 4096, %s2156_s15, %s992_s25, %s1705_s24, %s1705_s24, %s1706_s10  }
 0x1b7 PF: > { %s1021_s9 = sand.u32 1, %s1678_s12   ;;  %p2232_p12 = scmp.ne.s32.totalorder %s2222_s23, 0 }
 0x1b8   : > { %p2233_p11 = scmp.ge.s32.totalorder %s1698_s17, 2  ;;  %s1022_s18 = scalar_lea.sflag [#allocation5], %s1021_s9 }
 0x1ba   : > { %p1366_p0 = pnand %p2233_p11, %p2232_p12 }
 0x1bc   : > { %1673 = dma.done.wait (!%p1366_p0), %s1022_s18, 4096  }
 0x1bd   : > { %1675 = vsyncadd (!%p1366_p0), %s1022_s18, 4294963200  ;;  %s20_s17 = sadd.s32 1, %s1698_s17   ;;  %s2234_s12 = smov %s1682_s13 }
 0x1be   : > { %p17_p5 = scmp.ge.s32.totalorder %s20_s17, 4   ;;  %s2235_s13 = smov %s1686_s14 }
 0x1bf   : > { %s2236_s14 = smov %s1835_s5  ;;  %s2237_s15 = smov %s1694_s16 }
 0x1c0   : > { %s2238_s16 = smov %s2240_s28  ;;  %19 = sbr.rel (!%p17_p5) target bundleno = 7 (0x7), region = 93 }
 0x1c7   :  { %1027 = vsyncpa [#allocation4], 1 }
 0x1c8   :  { %1029 = vsyncpa [#allocation4 + $0x1], 1 }
 0x1c9   :  { %1030 = vsyncpa [#allocation7], 1 }
 0x1ca   :  { %1031 = vsyncpa [#allocation5], 1 }
 0x1cb   :  { %1033 = vsyncpa [#allocation5 + $0x1], 1 }

</bundles_post_ra>
